<compile_context>
chip_gen: v7x
topology: tpu7x:2x2x1
jax: 0.10.0
libtpu: 0.0.40
codegen_flags: <defaults>
</compile_context>

<pallas_src>
import jax
import jax.numpy as jnp
import numpy as np
from jax.experimental import pallas as pl
from jax.experimental.pallas import tpu as pltpu


# --------------------------------------------------------------------------- #
# Pallas kernel factory: entire forward pass for one batch tile (TB rows).
# --------------------------------------------------------------------------- #
def _make_kernel(T, C1, C2, tb, k1):
    """All sizes are static Python ints.  Per grid step:
         xwin_ref: (rt, 5)   bf16   x[b, t-2 .. t+2] window per output row
         w1_ref:   (5, 128)  bf16   block-banded conv1 taps (eval at t-1,t,t+1), lane-padded
         b1_ref:   (1, 128)  f32
         w2_ref:   (128, C2) bf16   conv2 taps stacked along padded K=128
         b2_ref:   (1, C2)   f32
         wfc_ref:  (C2, EP)  f32    fc weight, transposed + zero-padded to EP lanes
         bfc_ref:  (1, EP)   f32
         out_ref:  (tb, EP)  f32
    """
    rt = tb * T
    t_is_pow2 = (T & (T - 1)) == 0
    reshape_pool = (T % 8) == 0            # sublane-aligned segment reshape is safe

    def kernel(xwin_ref, w1_ref, b1_ref, w2_ref, b2_ref, wfc_ref, bfc_ref, out_ref):
        # conv1 (+bias, ReLU) for the 3 shifted positions conv2 needs: 1 matmul.
        # bf16 operands, f32 accumulation.  y1: (rt, 128) lane-dense.
        y1 = jnp.dot(xwin_ref[...], w1_ref[...], preferred_element_type=jnp.float32)
        y1 = jnp.maximum(y1 + b1_ref[...], 0.0)

        # conv2 zero-padding mask generated in-kernel (VPU compares, hides under MXU):
        # t==0 kills the left-shift block (cols [0,C1)); t==T-1 kills (cols [2C1,3C1)).
        row = jax.lax.broadcasted_iota(jnp.int32, (rt, k1), 0)
        col = jax.lax.broadcasted_iota(jnp.int32, (rt, k1), 1)
        t = (row & (T - 1)) if t_is_pow2 else (row % T)
        kill = ((col < C1) & (t == 0)) | \
               ((col >= 2 * C1) & (col < 3 * C1) & (t == T - 1))
        y1 = jnp.where(kill, 0.0, y1)

        # conv2 (+bias, ReLU): all three taps fused into one K=128 contraction.
        y2 = jnp.dot(y1.astype(w2_ref.dtype), w2_ref[...],
                     preferred_element_type=jnp.float32)
        y2 = jnp.maximum(y2 + b2_ref[...], 0.0)                        # (rt, C2)

        # AdaptiveAvgPool1d(1): mean over T per batch row (no pool matmul/buffer).
        if reshape_pool:
            z = jnp.sum(y2.reshape(tb, T, C2), axis=1) * (1.0 / T)     # (tb, C2)
        else:
            # Fallback when T is not sublane-aligned: iota-generated segment-mean
            # selector (mul/compare only, no integer div), transient in vregs.
            b_idx = jax.lax.broadcasted_iota(jnp.int32, (tb, rt), 0)
            r_idx = jax.lax.broadcasted_iota(jnp.int32, (tb, rt), 1)
            seg = (r_idx >= b_idx * T) & (r_idx < b_idx * T + T)
            P = jnp.where(seg, 1.0 / T, 0.0)
            z = jnp.dot(P, y2, preferred_element_type=jnp.float32)     # (tb, C2)

        # Final Linear layer; lane-dense (tb, EP) store.
        out_ref[...] = (jnp.dot(z, wfc_ref[...], preferred_element_type=jnp.float32)
                        + bfc_ref[...])

    return kernel


# --------------------------------------------------------------------------- #
# Wrapper
# --------------------------------------------------------------------------- #
def conv1d_embedding(x, params, *, batch_tile=64):
    """Pallas forward of Conv1DEmbedding.  x: (B, T) or (B, T, 1) -> (B, embed_dim)."""
    if x.ndim == 3:
        x = jnp.squeeze(x, axis=-1)          # PyTorch path requires in_channels == 1
    x = x.astype(jnp.float32)
    B, T = x.shape

    C1 = params["conv1_w"].shape[0]          # 32
    C2 = params["conv2_w"].shape[0]          # 64
    E = params["fc_w"].shape[0]              # embed_dim
    EP = pl.cdiv(E, 128) * 128               # lane-dense output slab
    assert 3 * C1 <= 128, "fused conv1 blocks must fit one 128-lane tile"
    K1 = 128                                 # 3*C1 zero-padded to a full lane tile

    # ---- batch tiling: tb (and rt = tb*T) must be multiples of 8 -------------
    tb = max(8, (int(batch_tile) // 8) * 8)
    b_ceil8 = pl.cdiv(B, 8) * 8
    tb = min(tb, b_ceil8)
    if b_ceil8 >= 16 and tb >= b_ceil8:      # keep >=2 grid steps (dual-TC on v7x)
        tb = max(8, (b_ceil8 // 16) * 8)
    b_pad = pl.cdiv(B, tb) * tb
    rt = tb * T                              # MXU rows per grid step (multiple of 8)

    # ---- one-time layout prep (tiny, runs in XLA outside the kernel) ---------
    # 5-tap im2col window: xwin[b*T+t, j] = x[b, t+j-2]; emitted in bf16 to halve
    # the im2col HBM traffic (matters most on v5e's lower HBM bandwidth).
    xb = jnp.pad(x, ((0, b_pad - B), (2, 2)))                         # (b_pad, T+4)
    xwin = jnp.stack([xb[:, j:j + T] for j in range(5)], axis=-1)     # (b_pad, T, 5)
    xwin = xwin.reshape(b_pad * T, 5).astype(jnp.bfloat16)
    # TODO(synk): for very large B on v5e, build the 5-tap window in-kernel from a
    # (tb, T+4) x tile instead of materializing xwin in HBM.

    # Block-banded conv1 weight: evaluates conv1 at t-1, t, t+1 in one matmul.
    w1t = jnp.transpose(params["conv1_w"][:, 0, :])                   # (3, C1)
    w1big = jnp.zeros((5, K1), jnp.float32)
    for k in range(3):
        w1big = w1big.at[k:k + 3, k * C1:(k + 1) * C1].set(w1t)
    w1big = w1big.astype(jnp.bfloat16)
    b1big = jnp.zeros((1, K1), jnp.float32).at[0, :3 * C1].set(
        jnp.tile(params["conv1_b"], 3))

    # conv2 taps stacked along the (zero-padded) K=128 contraction dim.
    w2t = jnp.zeros((K1, C2), jnp.float32).at[:3 * C1, :].set(
        jnp.transpose(params["conv2_w"], (2, 1, 0)).reshape(3 * C1, C2))
    w2t = w2t.astype(jnp.bfloat16)
    b2r = params["conv2_b"][None, :].astype(jnp.float32)

    # fc weight transposed + zero-padded to a lane-dense EP slab.  This matmul is
    # (tb, C2) x (C2, EP) per step -- negligible, so keep f32 operands/precision.
    wfc = jnp.zeros((C2, EP), jnp.float32).at[:, :E].set(jnp.transpose(params["fc_w"]))
    bfc = jnp.zeros((1, EP), jnp.float32).at[0, :E].set(params["fc_b"])

    grid = (b_pad // tb,)
    out = pl.pallas_call(
        _make_kernel(T, C1, C2, tb, K1),
        out_shape=jax.ShapeDtypeStruct((b_pad, EP), jnp.float32),
        grid_spec=pltpu.PrefetchScalarGridSpec(
            num_scalar_prefetch=0,
            grid=grid,
            in_specs=[
                pl.BlockSpec((rt, 5), lambda i: (i, 0)),      # x windows: tiled over batch
                pl.BlockSpec((5, K1), lambda i: (0, 0)),      # weights/biases: resident
                pl.BlockSpec((1, K1), lambda i: (0, 0)),
                pl.BlockSpec((K1, C2), lambda i: (0, 0)),
                pl.BlockSpec((1, C2), lambda i: (0, 0)),
                pl.BlockSpec((C2, EP), lambda i: (0, 0)),
                pl.BlockSpec((1, EP), lambda i: (0, 0)),
            ],
            out_specs=pl.BlockSpec((tb, EP), lambda i: (i, 0)),
        ),
        compiler_params=pltpu.CompilerParams(
            dimension_semantics=("parallel",),   # batch tiles are independent
        ),
    )(xwin, w1big, b1big, w2t, b2r, wfc, bfc)

    # Padded batch rows (b_pad - B) hold bias-driven garbage by construction;
    # slice them off here and never alias/reuse the padded buffer downstream.
    return out[:B, :E]


# --------------------------------------------------------------------------- #
# Parameter init (PyTorch shapes) and pure-JAX reference (correctness check).
# --------------------------------------------------------------------------- #
def init_conv1d_embedding_params(key, embed_dim):
    ks = jax.random.split(key, 6)

    def u(k, shape, fan_in):
        bound = 1.0 / np.sqrt(fan_in)
        return jax.random.uniform(k, shape, jnp.float32, minval=-bound, maxval=bound)

    return {
        "conv1_w": u(ks[0], (32, 1, 3), 1 * 3),
        "conv1_b": u(ks[1], (32,), 1 * 3),
        "conv2_w": u(ks[2], (64, 32, 3), 32 * 3),
        "conv2_b": u(ks[3], (64,), 32 * 3),
        "fc_w":   u(ks[4], (embed_dim, 64), 64),
        "fc_b":   u(ks[5], (embed_dim,), 64),
    }


def _conv1d_k3_same_ref(x_ncw, w, b):
    # x_ncw: (B, Cin, T), w: (Cout, Cin, 3), b: (Cout,); stride 1, padding 1.
    T = x_ncw.shape[-1]
    xp = jnp.pad(x_ncw, ((0, 0), (0, 0), (1, 1)))
    out = b[None, :, None]
    for k in range(3):
        out = out + jnp.einsum("bct,dc->bdt", xp[:, :, k:k + T], w[:, :, k],
                               precision=jax.lax.Precision.HIGHEST)
    return out


def conv1d_embedding_ref(x, params):
    if x.ndim == 3:
        x = jnp.squeeze(x, axis=-1)
    x = x.astype(jnp.float32)
    h = x[:, None, :]                                                 # (B, 1, T)
    h = jax.nn.relu(_conv1d_k3_same_ref(h, params["conv1_w"], params["conv1_b"]))
    h = jax.nn.relu(_conv1d_k3_same_ref(h, params["conv2_w"], params["conv2_b"]))
    z = jnp.mean(h, axis=-1)                                          # AdaptiveAvgPool1d(1)
    return (jnp.dot(z, jnp.transpose(params["fc_w"]),
                    precision=jax.lax.Precision.HIGHEST) + params["fc_b"])


if __name__ == "__main__":
    B, INPUT_SIZE, EMBED_DIM = 4, 16, 32     # x: (batch, seq); seq == input_size

    key = jax.random.PRNGKey(0)
    k_x, k_p = jax.random.split(key)
    x = jax.random.normal(k_x, (B, INPUT_SIZE), jnp.float32)
    params = init_conv1d_embedding_params(k_p, EMBED_DIM)

    out = jax.jit(conv1d_embedding)(x, params)
    out = jax.block_until_ready(out)
    assert out.shape == (B, EMBED_DIM), out.shape

    ref = conv1d_embedding_ref(x, params)
    # bf16 MXU operands (f32 accumulation): tolerance loosened accordingly.
    np.testing.assert_allclose(np.asarray(out), np.asarray(ref), rtol=2e-2, atol=2e-3)
    print("KERNEL_OK")
</pallas_src>

<mosaic_0001>
module attributes {stable_mosaic.version = 11 : i64} {
  func.func @kernel(%arg0: i32, %arg1: memref<128x5xbf16, #tpu.memory_space<vmem>>, %arg2: memref<5x128xbf16, #tpu.memory_space<vmem>>, %arg3: memref<1x128xf32, #tpu.memory_space<vmem>>, %arg4: memref<128x64xbf16, #tpu.memory_space<vmem>>, %arg5: memref<1x64xf32, #tpu.memory_space<vmem>>, %arg6: memref<64x128xf32, #tpu.memory_space<vmem>>, %arg7: memref<1x128xf32, #tpu.memory_space<vmem>>, %arg8: memref<8x128xf32, #tpu.memory_space<vmem>>) attributes {dimension_semantics = [#tpu.dimension_semantics<parallel>], iteration_bounds = array<i64: 1>, scalar_prefetch = 0 : i64, scratch_operands = 0 : i64, tpu.core_type = #tpu.core_type<tc>, window_params = [{transform_indices = @transform_0, window_bounds = array<i64: 128, 5>}, {pipeline_mode = #tpu.pipeline_mode<synchronous>, transform_indices = @transform_1, window_bounds = array<i64: 5, 128>}, {pipeline_mode = #tpu.pipeline_mode<synchronous>, transform_indices = @transform_2, window_bounds = array<i64: 1, 128>}, {pipeline_mode = #tpu.pipeline_mode<synchronous>, transform_indices = @transform_3, window_bounds = array<i64: 128, 64>}, {pipeline_mode = #tpu.pipeline_mode<synchronous>, transform_indices = @transform_4, window_bounds = array<i64: 1, 64>}, {pipeline_mode = #tpu.pipeline_mode<synchronous>, transform_indices = @transform_5, window_bounds = array<i64: 64, 128>}, {pipeline_mode = #tpu.pipeline_mode<synchronous>, transform_indices = @transform_6, window_bounds = array<i64: 1, 128>}, {transform_indices = @transform_7, window_bounds = array<i64: 8, 128>}]} {
    %c0 = arith.constant 0 : index
    %c0_0 = arith.constant 0 : index
    %0 = vector.load %arg1[%c0, %c0_0] : memref<128x5xbf16, #tpu.memory_space<vmem>>, vector<128x5xbf16>
    %c0_1 = arith.constant 0 : index
    %c0_2 = arith.constant 0 : index
    %1 = vector.load %arg2[%c0_1, %c0_2] : memref<5x128xbf16, #tpu.memory_space<vmem>>, vector<5x128xbf16>
    %cst = arith.constant dense<0.000000e+00> : vector<128x128xf32>
    %2 = tpu.matmul %0, %1, %cst {dimension_numbers = #tpu.dot_dimension_numbers<[1], [0], [0], [1], [0, 0, 1, 1], [], []>} : vector<128x5xbf16>, vector<5x128xbf16>, vector<128x128xf32> -> vector<128x128xf32>
    %c0_3 = arith.constant 0 : index
    %c0_4 = arith.constant 0 : index
    %3 = vector.load %arg3[%c0_3, %c0_4] : memref<1x128xf32, #tpu.memory_space<vmem>>, vector<1x128xf32>
    %4 = vector.broadcast %3 : vector<1x128xf32> to vector<128x128xf32>
    %5 = arith.addf %2, %4 : vector<128x128xf32>
    %cst_5 = arith.constant 0.000000e+00 : f32
    %6 = vector.broadcast %cst_5 : f32 to vector<128x128xf32>
    %7 = arith.maximumf %5, %6 : vector<128x128xf32>
    %8 = tpu.iota {dimensions = array<i32: 0>} : vector<128x128xi32>
    %9 = tpu.iota {dimensions = array<i32: 1>} : vector<128x128xi32>
    %c15_i32 = arith.constant 15 : i32
    %10 = vector.broadcast %c15_i32 : i32 to vector<128x128xi32>
    %11 = arith.andi %8, %10 : vector<128x128xi32>
    %c32_i32 = arith.constant 32 : i32
    %12 = vector.broadcast %c32_i32 : i32 to vector<128x128xi32>
    %13 = arith.cmpi slt, %9, %12 : vector<128x128xi32>
    %c0_i32 = arith.constant 0 : i32
    %14 = vector.broadcast %c0_i32 : i32 to vector<128x128xi32>
    %15 = arith.cmpi eq, %11, %14 : vector<128x128xi32>
    %16 = arith.andi %13, %15 : vector<128x128xi1>
    %c64_i32 = arith.constant 64 : i32
    %17 = vector.broadcast %c64_i32 : i32 to vector<128x128xi32>
    %18 = arith.cmpi sge, %9, %17 : vector<128x128xi32>
    %c96_i32 = arith.constant 96 : i32
    %19 = vector.broadcast %c96_i32 : i32 to vector<128x128xi32>
    %20 = arith.cmpi slt, %9, %19 : vector<128x128xi32>
    %21 = arith.andi %18, %20 : vector<128x128xi1>
    %c15_i32_6 = arith.constant 15 : i32
    %22 = vector.broadcast %c15_i32_6 : i32 to vector<128x128xi32>
    %23 = arith.cmpi eq, %11, %22 : vector<128x128xi32>
    %24 = arith.andi %21, %23 : vector<128x128xi1>
    %25 = arith.ori %16, %24 : vector<128x128xi1>
    %cst_7 = arith.constant 0.000000e+00 : f32
    %26 = vector.broadcast %cst_7 : f32 to vector<128x128xf32>
    %27 = arith.select %25, %26, %7 : vector<128x128xi1>, vector<128x128xf32>
    %28 = arith.truncf %27 : vector<128x128xf32> to vector<128x128xbf16>
    %c0_8 = arith.constant 0 : index
    %c0_9 = arith.constant 0 : index
    %29 = vector.load %arg4[%c0_8, %c0_9] : memref<128x64xbf16, #tpu.memory_space<vmem>>, vector<128x64xbf16>
    %cst_10 = arith.constant dense<0.000000e+00> : vector<128x64xf32>
    %30 = tpu.matmul %28, %29, %cst_10 {dimension_numbers = #tpu.dot_dimension_numbers<[1], [0], [0], [1], [0, 0, 1, 1], [], []>} : vector<128x128xbf16>, vector<128x64xbf16>, vector<128x64xf32> -> vector<128x64xf32>
    %c0_11 = arith.constant 0 : index
    %c0_12 = arith.constant 0 : index
    %31 = vector.load %arg5[%c0_11, %c0_12] : memref<1x64xf32, #tpu.memory_space<vmem>>, vector<1x64xf32>
    %32 = vector.broadcast %31 : vector<1x64xf32> to vector<128x64xf32>
    %33 = arith.addf %30, %32 : vector<128x64xf32>
    %cst_13 = arith.constant 0.000000e+00 : f32
    %34 = vector.broadcast %cst_13 : f32 to vector<128x64xf32>
    %35 = arith.maximumf %33, %34 : vector<128x64xf32>
    %36 = vector.shape_cast %35 : vector<128x64xf32> to vector<8x16x64xf32>
    %cst_14 = arith.constant dense<0.000000e+00> : vector<8x64xf32>
    %37 = vector.multi_reduction <add>, %36, %cst_14 [1] : vector<8x16x64xf32> to vector<8x64xf32>
    %cst_15 = arith.constant 6.250000e-02 : f32
    %38 = vector.broadcast %cst_15 : f32 to vector<8x64xf32>
    %39 = arith.mulf %37, %38 : vector<8x64xf32>
    %c0_16 = arith.constant 0 : index
    %c0_17 = arith.constant 0 : index
    %40 = vector.load %arg6[%c0_16, %c0_17] : memref<64x128xf32, #tpu.memory_space<vmem>>, vector<64x128xf32>
    %cst_18 = arith.constant dense<0.000000e+00> : vector<8x128xf32>
    %41 = tpu.matmul %39, %40, %cst_18 {dimension_numbers = #tpu.dot_dimension_numbers<[1], [0], [0], [1], [0, 0, 1, 1], [], []>} : vector<8x64xf32>, vector<64x128xf32>, vector<8x128xf32> -> vector<8x128xf32>
    %c0_19 = arith.constant 0 : index
    %c0_20 = arith.constant 0 : index
    %42 = vector.load %arg7[%c0_19, %c0_20] : memref<1x128xf32, #tpu.memory_space<vmem>>, vector<1x128xf32>
    %43 = vector.broadcast %42 : vector<1x128xf32> to vector<8x128xf32>
    %44 = arith.addf %41, %43 : vector<8x128xf32>
    %c0_21 = arith.constant 0 : index
    %c0_22 = arith.constant 0 : index
    %45 = vector.load %arg8[%c0_21, %c0_22] : memref<8x128xf32, #tpu.memory_space<vmem>>, vector<8x128xf32>
    tpu.vector_store %arg8[%c0_21, %c0_22], %44 {strides = array<i32>} : memref<8x128xf32, #tpu.memory_space<vmem>>, vector<8x128xf32>,
    return
  }
  func.func @transform_0(%arg0: i32) -> (i32, i32) {
    %c0_i32 = arith.constant 0 : i32
    %c0_i32_0 = arith.constant 0 : i32
    return %arg0, %c0_i32 : i32, i32
  }
  func.func @transform_1(%arg0: i32) -> (i32, i32) {
    %c0_i32 = arith.constant 0 : i32
    %c0_i32_0 = arith.constant 0 : i32
    %c0_i32_1 = arith.constant 0 : i32
    return %c0_i32, %c0_i32_0 : i32, i32
  }
  func.func @transform_2(%arg0: i32) -> (i32, i32) {
    %c0_i32 = arith.constant 0 : i32
    %c0_i32_0 = arith.constant 0 : i32
    %c0_i32_1 = arith.constant 0 : i32
    return %c0_i32, %c0_i32_0 : i32, i32
  }
  func.func @transform_3(%arg0: i32) -> (i32, i32) {
    %c0_i32 = arith.constant 0 : i32
    %c0_i32_0 = arith.constant 0 : i32
    %c0_i32_1 = arith.constant 0 : i32
    return %c0_i32, %c0_i32_0 : i32, i32
  }
  func.func @transform_4(%arg0: i32) -> (i32, i32) {
    %c0_i32 = arith.constant 0 : i32
    %c0_i32_0 = arith.constant 0 : i32
    %c0_i32_1 = arith.constant 0 : i32
    return %c0_i32, %c0_i32_0 : i32, i32
  }
  func.func @transform_5(%arg0: i32) -> (i32, i32) {
    %c0_i32 = arith.constant 0 : i32
    %c0_i32_0 = arith.constant 0 : i32
    %c0_i32_1 = arith.constant 0 : i32
    return %c0_i32, %c0_i32_0 : i32, i32
  }
  func.func @transform_6(%arg0: i32) -> (i32, i32) {
    %c0_i32 = arith.constant 0 : i32
    %c0_i32_0 = arith.constant 0 : i32
    %c0_i32_1 = arith.constant 0 : i32
    return %c0_i32, %c0_i32_0 : i32, i32
  }
  func.func @transform_7(%arg0: i32) -> (i32, i32) {
    %c0_i32 = arith.constant 0 : i32
    %c0_i32_0 = arith.constant 0 : i32
    return %arg0, %c0_i32 : i32, i32
  }
}

</mosaic_0001>

<bundles_post_ra>
// kernel: conv1d_embedding.1
= control target key start
LH: loop header
LB: loop body
LE: loop exit
PB: predicated region body
PF: predicated region fallthrough
CT: control target
= control target key end

     0   :  { %vm116_vm0 = vcmask 1041408   ;;  %vm117_vm1 = vcmask 1042432   ;;  %vm91_vm2 = vcmask 39936   ;;  %v961_v1 = vmov 65535   ;;  %s1368_s1 = inlined_call_operand.vmem [shape: bf16[5,128], index: 1, kind: input, shape index: {}]   ;;  %s1369_s0 = inlined_call_operand.vmem [shape: bf16[128,5], index: 0, kind: input, shape index: {}]   ;;  %s1370_s3 = inlined_call_operand.vmem [shape: bf16[128,64], index: 3, kind: input, shape index: {}]   ;;  %s1371_s2 = inlined_call_operand.vmem [shape: f32[1,128], index: 2, kind: input, shape index: {}]   ;;  %s1372_s5 = inlined_call_operand.vmem [shape: f32[64,128], index: 5, kind: input, shape index: {}]   ;;  %s1373_s4 = inlined_call_operand.vmem [shape: f32[1,64], index: 4, kind: input, shape index: {}]   ;;  %s1374_s6 = inlined_call_operand.vmem [shape: f32[1,128], index: 6, kind: input, shape index: {}]   ;;  %s1375_s7 = inlined_call_operand.vmem [shape: f32[8,128], index: 7, kind: output, shape index: {}]  }
   0x1   :  { %v43_v0 = vld [vmem:[%s1368_s1] sm:$0x7]  ;;  %v118_v2 = vsel %vm116_vm0, 4294967295, %v961_v1  ;;  %v946_v6 = vld [vmem:[%s1369_s0 + $0x8] sm:$0xff]   ;;  %v947_v7 = vld [vmem:[%s1369_s0 + $0x10] sm:$0xff]   ;;  %v236_v21 = vlaneseq }
   0x2   :  { %v945_v3 = vld [vmem:[%s1369_s0] sm:$0xff]   ;;  %v119_v4 = vsel %vm117_vm1, %v118_v2, 0  ;;  %v954_v9 = vld [vmem:[%s1370_s3 + $0x8] sm:$0xff]   ;;  %v948_v10 = vld [vmem:[%s1369_s0 + $0x18] sm:$0xff]  }
   0x3   :  { %v121_v5 = vand.u32 %v119_v4, %v43_v0  ;;  %862 = vmatprep.mubr.msk.bf16.mxu0 %vm91_vm2, %v945_v3  ;;  %v953_v8 = vld [vmem:[%s1370_s3] sm:$0xff]   ;;  %v955_v12 = vld [vmem:[%s1370_s3 + $0x10] sm:$0xff]   ;;  %v956_v13 = vld [vmem:[%s1370_s3 + $0x18] sm:$0xff]   ;;  %v1064_v22 = vshrl.u32 %v236_v21, 7  ;;  %v1067_v24 = vand.u32 127, %v236_v21 }
   0x4   :  { %878 = vmatprep.subr.bf16.mxu1 %v953_v8  ;;  %v949_v11 = vld [vmem:[%s1369_s0 + $0x20] sm:$0xff]   ;;  %v950_v14 = vld [vmem:[%s1369_s0 + $0x28] sm:$0xff]   ;;  %v951_v15 = vld [vmem:[%s1369_s0 + $0x30] sm:$0xff]  }
   0x5   :  { %860 = vmatprep.subr.bf16.mxu0 %v121_v5  ;;  %879 = vmatpush3.bf16.msra.mxu1 %v953_v8  ;;  %v957_v16 = vld [vmem:[%s1370_s3 + $0x20] sm:$0xff]   ;;  %v958_v17 = vld [vmem:[%s1370_s3 + $0x28] sm:$0xff]   ;;  %v952_v18 = vld [vmem:[%s1369_s0 + $0x38] sm:$0xff]   ;;  %v238_v23 = vadd.s32 8, %v1064_v22  ;;  %v240_v26 = vadd.s32 24, %v1064_v22  ;;  %vm304_vm3 = vcmp.ge.s32.totalorder %v1067_v24, 64 }
   0x6   :  { %861 = vmatpush3.bf16.msra.mxu0 %v121_v5  ;;  %880 = vmatprep.subr.bf16.mxu1 %v954_v9  ;;  %v959_v19 = vld [vmem:[%s1370_s3 + $0x30] sm:$0xff]   ;;  %v960_v20 = vld [vmem:[%s1370_s3 + $0x38] sm:$0xff]   ;;  %vm305_vm4 = vcmp.lt.s32.totalorder %v1067_v24, 96  ;;  %v239_v27 = vadd.s32 16, %v1064_v22  ;;  %v255_v28 = vand.u32 15, %v1064_v22  ;;  %vm271_vm7 = vcmp.lt.s32.totalorder %v1067_v24, 32 }
   0x7   :  { %v256_v25 = vand.u32 15, %v238_v23  ;;  %vm1074_vm5 = vmand %vm304_vm3, %vm305_vm4  ;;  %v258_v30 = vand.u32 15, %v240_v26  ;;  %v242_v32 = vadd.s32 40, %v1064_v22  ;;  %v241_v33 = vadd.s32 32, %v1064_v22  ;;  %v1108_v41 = vld [vmem:[%s1371_s2] ss:$0 sm:$0xff] }
   0x8   :  { %v257_v31 = vand.u32 15, %v239_v27  ;;  %vm272_vm8 = vcmp.eq.s32.totalorder %v255_v28, 0  ;;  %v244_v37 = vadd.s32 56, %v1064_v22  ;;  %v243_v38 = vadd.s32 48, %v1064_v22  ;;  %v650_v21 = vld [vmem:[%s1372_s5 + $0x30] sm:$0xff]  ;;  %v651_v23 = vld [vmem:[%s1372_s5 + $0x38] sm:$0xff] }
   0x9   :  { %863 = vmatmul.mubr.msk.bf16.vlgmr.msra.gmra.mrb[0].mxu0 %vm91_vm2, %v946_v6  ;;  %881 = vmatpush3.bf16.msra.mxu1 %v954_v9  ;;  %vm308_vm6 = vcmp.eq.s32.totalorder %v256_v25, 15  ;;  %vm310_vm10 = vcmp.eq.s32.totalorder %v258_v30, 15  ;;  %vm1085_vm11 = vmand %vm271_vm7, %vm272_vm8  ;;  %v260_v36 = vand.u32 15, %v242_v32  ;;  %v259_v40 = vand.u32 15, %v241_v33 }
   0xa   :  { %866 = vmatprep.mubr.msk.bf16.mxu0 %vm91_vm2, %v947_v7  ;;  %882 = vmatprep.subr.bf16.mxu1 %v955_v12  ;;  %vm324_vm9 = vmand %vm1074_vm5, %vm308_vm6  ;;  %vm274_vm12 = vcmp.eq.s32.totalorder %v257_v31, 0  ;;  %v262_v43 = vand.u32 15, %v244_v37  ;;  %v261_v44 = vand.u32 15, %v243_v38  ;;  %v246_v47 = vadd.s32 72, %v1064_v22 }
   0xb   :  { %vm1089_vm13 = vmneg %vm324_vm9  ;;  %vm276_vm6 = vcmp.eq.s32.totalorder %v259_v40, 0  ;;  %v245_v54 = vadd.s32 64, %v1064_v22  ;;  %v248_v61 = vadd.s32 88, %v1064_v22  ;;  %v247_v0 = vadd.s32 80, %v1064_v22 }
   0xc   :  { %vm326_vm14 = vmand %vm1074_vm5, %vm310_vm10  ;;  %vm1133_vm10 = vcmp.eq.s32.totalorder %v262_v43, 15  ;;  %v264_v60 = vand.u32 15, %v246_v47  ;;  %v249_v25 = vadd.s32 96, %v1064_v22  ;;  %v252_v34 = vadd.s32 120, %v1064_v22 }
   0xd   :  { %883 = vmatpush3.bf16.msra.mxu1 %v955_v12  ;;  %vm1099_vm15 = vmand %vm271_vm7, %vm274_vm12  ;;  %vm278_vm12 = vcmp.eq.s32.totalorder %v261_v44, 0  ;;  %v263_v4 = vand.u32 15, %v245_v54 }
   0xe   :  { %884 = vmatprep.subr.bf16.mxu1 %v956_v13  ;;  %vm785_vm0 = vmneg %vm1085_vm11  ;;  %v267_v40 = vand.u32 15, %v249_v25  ;;  %v270_v47 = vand.u32 15, %v252_v34  ;;  %v939_v25 = vpack.c.bf16 %v651_v23, %v650_v21 }
   0xf   :  { %vm789_vm1 = vmneg %vm326_vm14 }
  0x10   :  { %vm790_vm3 = vmneg %vm1099_vm15 }
  0x11   :  { %867 = vmatmul.mubr.msk.bf16.gmra.mrb[4].mxu0 %vm91_vm2, %v948_v10  ;;  %885 = vmatpush3.bf16.msra.mxu1 %v956_v13  ;;  %vm1118_vm4 = vmpackc.low %vm1089_vm13, %vm785_vm0  ;;  %v266_v10 = vand.u32 15, %v248_v61  ;;  %v265_v13 = vand.u32 15, %v247_v0 }
  0x12   :  { %870 = vmatprep.mubr.msk.bf16.mxu0 %vm91_vm2, %v949_v11  ;;  %886 = vmatprep.subr.bf16.mxu1 %v957_v16  ;;  %vm1129_vm9 = vmpackc.low %vm789_vm1, %vm790_vm3 }
  0x13   :  { %vm1141_vm11 = vmand %vm271_vm7, %vm276_vm6 }
  0x14   :  { %vm330_vm14 = vmand %vm1074_vm5, %vm1133_vm10 }
  0x15   :  { %887 = vmatpush3.bf16.msra.mxu1 %v957_v16  ;;  %vm1158_vm15 = vmand %vm271_vm7, %vm278_vm12  ;;  %vm282_vm12 = vcmp.eq.s32.totalorder %v265_v13, 0  ;;  %v647_v16 = vld [vmem:[%s1372_s5 + $0x18] sm:$0xff] }
  0x16   :  { %888 = vmatprep.subr.bf16.mxu1 %v958_v17  ;;  %vm795_vm0 = vmneg %vm1141_vm11  ;;  %vm1199_vm11 = vcmp.eq.s32.totalorder %v266_v10, 15 }
  0x17   :  { %vm1164_vm1 = vmneg %vm330_vm14 }
  0x18   :  { %vm800_vm3 = vmneg %vm1158_vm15 }
  0x19   :  { %871 = vmatmul.mubr.msk.bf16.gmra.mrb[8].mxu0 %vm91_vm2, %v950_v14  ;;  %889 = vmatpush3.bf16.msra.mxu1 %v958_v17  ;;  %v250_v17 = vadd.s32 104, %v1064_v22  ;;  %vm1195_vm10 = vmpackc.low %vm1164_vm1, %vm800_vm3 }
  0x1a   :  { %874 = vmatprep.mubr.msk.bf16.mxu0 %vm91_vm2, %v951_v15  ;;  %890 = vmatprep.subr.bf16.mxu1 %v959_v19  ;;  %vm334_vm14 = vmand %vm1074_vm5, %vm1199_vm11  ;;  %vm1262_vm11 = vcmp.eq.s32.totalorder %v270_v47, 15 }
  0x1b   :  { %v268_v33 = vand.u32 15, %v250_v17  ;;  %vm1222_vm15 = vmand %vm271_vm7, %vm282_vm12 }
  0x1c   :  { %vm1232_vm1 = vmneg %vm334_vm14 }
  0x1d   :  { %891 = vmatpush3.bf16.msra.mxu1 %v959_v19  ;;  %vm810_vm3 = vmneg %vm1222_vm15 }
  0x1e   :  { %892 = vmatprep.subr.bf16.mxu1 %v960_v20  ;;  %vm338_vm14 = vmand %vm1074_vm5, %vm1262_vm11  ;;  %vm673_vm11 = vcmask 1044484  }
  0x21   :  { %875 = vmatmul.mubr.msk.bf16.gmra.mrb[12].mxu0 %vm91_vm2, %v952_v18  ;;  %893 = vmatpush3.bf16.msra.mxu1 %v960_v20  ;;  %vm1110_vm2 = vcmp.eq.s32.totalorder %v260_v36, 15  ;;  %v251_v36 = vadd.s32 112, %v1064_v22 }
  0x22   :  { %vm328_vm8 = vmand %vm1074_vm5, %vm1110_vm2  ;;  %vm1168_vm2 = vcmp.eq.s32.totalorder %v264_v60, 15 }
  0x23   :  { %vm1146_vm13 = vmneg %vm328_vm8  ;;  %vm280_vm8 = vcmp.eq.s32.totalorder %v263_v4, 0 }
  0x24   :  { %vm1180_vm6 = vmpackc.low %vm1146_vm13, %vm795_vm0 }
  0xdc   :  { %v864_v45 = vpop.f32.mrb[0].mxu0 }
  0xdd   :  { %v166_v48 = vadd.f32 %v864_v45, %v1108_v41  ;;  %v157_v49 = vpop.f32.mrb[1].mxu0 }
  0xde   :  { %v158_v50 = vadd.f32 %v1108_v41, %v157_v49  ;;  %v865_v51 = vpop.f32.mrb[2].mxu0 }
  0xdf   :  { %v169_v55 = vadd.f32 %v865_v51, %v1108_v41  ;;  %v160_v56 = vpop.f32.mrb[3].mxu0  ;;  %v222_v62 = vmax.f32 %v166_v48, 0.0 }
  0xe0   :  { %v161_v58 = vadd.f32 %v1108_v41, %v160_v56  ;;  %v220_v1 = vmax.f32 %v158_v50, 0.0  ;;  %v269_v50 = vand.u32 15, %v251_v36 }
  0xe1   :  { %v223_v63 = vmax.f32 %v169_v55, 0.0 }
  0xe2   :  { %v221_v2 = vmax.f32 %v161_v58, 0.0  ;;  %vm286_vm12 = vcmp.eq.s32.totalorder %v269_v50, 0 }
  0xe3   :  { %v792_v5 = vpack.c.bf16 %v223_v63, %v222_v62  ;;  %vm1286_vm15 = vmand %vm271_vm7, %vm286_vm12  ;;  %vm677_vm12 = vcmask 1046534  }
  0xe4   :  { %v868_v6 = vpop.f32.mrb[4].mxu0  ;;  %v787_v7 = vpack.c.bf16 %v221_v2, %v220_v1 }
  0xe5   :  { %v182_v11 = vadd.f32 %v868_v6, %v1108_v41  ;;  %v173_v12 = vpop.f32.mrb[5].mxu0 }
  0xe6   :  { %v174_v14 = vadd.f32 %v1108_v41, %v173_v12  ;;  %v869_v15 = vpop.f32.mrb[6].mxu0  ;;  %894 = vmatprep.mubr.msk.bf16.mxu1 %vm1118_vm4, %v787_v7  ;;  %vm332_vm4 = vmand %vm1074_vm5, %vm1168_vm2  ;;  %vm1236_vm2 = vcmp.eq.s32.totalorder %v268_v33, 15  ;;  %v645_v12 = vld [vmem:[%s1372_s5 + $0x8] sm:$0xff] }
  0xe7   :  { %v185_v18 = vadd.f32 %v869_v15, %v1108_v41  ;;  %v176_v19 = vpop.f32.mrb[7].mxu0  ;;  %895 = vmatmul.mubr.msk.bf16.vlgmr.msra.gmra.mrb[0].mxu1 %vm1129_vm9, %v792_v5  ;;  %v226_v26 = vmax.f32 %v182_v11, 0.0  ;;  %vm1206_vm9 = vmand %vm271_vm7, %vm280_vm8  ;;  %vm284_vm8 = vcmp.eq.s32.totalorder %v267_v40, 0  ;;  %v646_v15 = vld [vmem:[%s1372_s5 + $0x10] sm:$0xff] }
  0xe8   :  { %v177_v20 = vadd.f32 %v1108_v41, %v176_v19  ;;  %v224_v30 = vmax.f32 %v174_v14, 0.0  ;;  %vm1210_vm13 = vmneg %vm332_vm4  ;;  %v962_v14 = vmov 0.0|0.0   ;;  %v933_v17 = vpack.c.bf16 %v647_v16, %v646_v15  ;;  %v649_v19 = vld [vmem:[%s1372_s5 + $0x28] sm:$0xff] }
  0xe9   :  { %v227_v27 = vmax.f32 %v185_v18, 0.0  ;;  %vm805_vm0 = vmneg %vm1206_vm9  ;;  %929 = vmatprep.subr.bf16.mxu0 %v962_v14  ;;  %v648_v18 = vld [vmem:[%s1372_s5 + $0x20] sm:$0xff] }
  0xea   :  { %v225_v31 = vmax.f32 %v177_v20, 0.0  ;;  %vm336_vm4 = vmand %vm1074_vm5, %vm1236_vm2  ;;  %v936_v20 = vpack.c.bf16 %v649_v19, %v648_v18 }
  0xeb   :  { %v802_v35 = vpack.c.bf16 %v227_v27, %v226_v26  ;;  %vm1268_vm9 = vmand %vm271_vm7, %vm284_vm8  ;;  %v964_v26 = vmov 0.0   ;;  %v1327_v27 = vld [vmem:[%s1373_s4] ss:$0 sm:$0xff]  ;;  %vm667_vm8 = vcmask 1041409  }
  0xec   :  { %v797_v37 = vpack.c.bf16 %v225_v31, %v224_v30  ;;  %v872_v38 = vpop.f32.mrb[8].mxu0  ;;  %vm815_vm5 = vmneg %vm1268_vm9  ;;  %vm675_vm9 = vcmask 1045509  }
  0xed   :  { %v198_v42 = vadd.f32 %v872_v38, %v1108_v41  ;;  %v189_v43 = vpop.f32.mrb[9].mxu0  ;;  %vm820_vm7 = vmneg %vm1286_vm15 }
  0xee   :  { %v190_v44 = vadd.f32 %v1108_v41, %v189_v43  ;;  %v873_v45 = vpop.f32.mrb[10].mxu0  ;;  %898 = vmatprep.mubr.msk.bf16.mxu1 %vm1180_vm6, %v797_v37  ;;  %vm1248_vm6 = vmpackc.low %vm1210_vm13, %vm805_vm0 }
  0xef   :  { %v201_v48 = vadd.f32 %v873_v45, %v1108_v41  ;;  %v192_v49 = vpop.f32.mrb[11].mxu0  ;;  %899 = vmatmul.mubr.msk.bf16.gmra.mrb[4].mxu1 %vm1195_vm10, %v802_v35  ;;  %v230_v53 = vmax.f32 %v198_v42, 0.0  ;;  %vm1258_vm10 = vmpackc.low %vm1232_vm1, %vm810_vm3  ;;  %vm963_vm3 = vmmov 0  }
  0xf0   :  { %v193_v51 = vadd.f32 %v1108_v41, %v192_v49  ;;  %v228_v55 = vmax.f32 %v190_v44, 0.0  ;;  %vm1272_vm13 = vmneg %vm336_vm4  ;;  %926 = vmatprep.mubr.msk.f32.mxu0 %vm963_vm3, %v964_v26  ;;  %vm669_vm4 = vcmask 1042434  }
  0xf1   :  { %v231_v54 = vmax.f32 %v201_v48, 0.0  ;;  %vm819_vm0 = vmneg %vm338_vm14 }
  0xf2   :  { %v229_v56 = vmax.f32 %v193_v51, 0.0  ;;  %vm816_vm1 = vmpackc.low %vm1272_vm13, %vm815_vm5  ;;  %vm679_vm13 = vcmask 1047559  }
  0xf3   :  { %v812_v59 = vpack.c.bf16 %v231_v54, %v230_v53  ;;  %vm821_vm2 = vmpackc.low %vm819_vm0, %vm820_vm7 }
  0xf4   :  { %v807_v61 = vpack.c.bf16 %v229_v56, %v228_v55  ;;  %v876_v62 = vpop.f32.mrb[12].mxu0 }
  0xf5   :  { %v214_v0 = vadd.f32 %v876_v62, %v1108_v41  ;;  %v205_v1 = vpop.f32.mrb[13].mxu0 }
  0xf6   :  { %v206_v2 = vadd.f32 %v1108_v41, %v205_v1  ;;  %v877_v3 = vpop.f32.mrb[14].mxu0  ;;  %902 = vmatprep.mubr.msk.bf16.mxu1 %vm1248_vm6, %v807_v61  ;;  %vm563_vm6 = vcmask 523264  }
  0xf7   :  { %v217_v5 = vadd.f32 %v877_v3, %v1108_v41  ;;  %v208_v6 = vpop.f32.mrb[15].mxu0  ;;  %903 = vmatmul.mubr.msk.bf16.gmra.mrb[8].mxu1 %vm1258_vm10, %v812_v59  ;;  %v234_v7 = vmax.f32 %v214_v0, 0.0  ;;  %vm671_vm10 = vcmask 1043459  }
  0xf8   :  { %v209_v29 = vadd.f32 %v1108_v41, %v208_v6  ;;  %v232_v24 = vmax.f32 %v206_v2, 0.0  ;;  %v644_v41 = vld [vmem:[%s1372_s5] sm:$0xff] }
  0xf9   :  { %v235_v8 = vmax.f32 %v217_v5, 0.0  ;;  %v930_v13 = vpack.c.bf16 %v645_v12, %v644_v41 }
  0xfa   :  { %v233_v9 = vmax.f32 %v209_v29, 0.0 }
  0xfb   :  { %v822_v10 = vpack.c.bf16 %v235_v8, %v234_v7  ;;  %931 = vmatpush3.bf16.msra.mxu0 %v930_v13 }
  0xfc   :  { %v817_v11 = vpack.c.bf16 %v233_v9, %v232_v24  ;;  %932 = vmatprep.subr.bf16.mxu0 %v962_v14 }
  0xfe   :  { %906 = vmatprep.mubr.msk.bf16.mxu1 %vm816_vm1, %v817_v11 }
  0xff   :  { %907 = vmatmul.mubr.msk.bf16.gmra.mrb[12].mxu1 %vm821_vm2, %v822_v10  ;;  %934 = vmatpush3.bf16.msra.mxu0 %v933_v17 }
 0x100   :  { %935 = vmatprep.subr.bf16.mxu0 %v962_v14 }
 0x103   :  { %937 = vmatpush3.bf16.msra.mxu0 %v936_v20 }
 0x104   :  { %938 = vmatprep.subr.bf16.mxu0 %v962_v14 }
 0x107   :  { %940 = vmatpush3.bf16.msra.mxu0 %v939_v25 }
 0x1ba   :  { %v896_v28 = vpop.f32.mrb[0].mxu1 }
 0x1bb   :  { %v493_v30 = vadd.f32 %v896_v28, %v1327_v27  ;;  %v484_v31 = vpop.f32.mrb[1].mxu1 }
 0x1bc   :  { %v485_v32 = vadd.f32 %v1327_v27, %v484_v31  ;;  %v897_v33 = vpop.f32.mrb[2].mxu1 }
 0x1bd   :  { %v549_v34 = vmax.f32 %v493_v30, 0.0  ;;  %v496_v35 = vadd.f32 %v897_v33, %v1327_v27  ;;  %v487_v36 = vpop.f32.mrb[3].mxu1 }
 0x1be   :  { %v547_v37 = vmax.f32 %v485_v32, 0.0  ;;  %v488_v38 = vadd.f32 %v1327_v27, %v487_v36 }
 0x1bf   :  { %v550_v39 = vmax.f32 %v496_v35, 0.0  ;;  %v573_v42 = vsel %vm563_vm6, %v549_v34, 0.0 }
 0x1c0   :  { %v548_v40 = vmax.f32 %v488_v38, 0.0  ;;  %v564_v44 = vsel %vm563_vm6, %v547_v37, 0.0 }
 0x1c1   :  { %v574_v43 = vsel %vm563_vm6, %v550_v39, 0.0 }
 0x1c2   :  { %v575_v45 = vadd.f32 %v574_v43, %v573_v42  ;;  %v565_v22 = vsel %vm563_vm6, %v548_v40, 0.0  ;;  %v900_v46 = vpop.f32.mrb[4].mxu1 }
 0x1c3   :  { %v566_v47 = vadd.f32 %v565_v22, %v564_v44  ;;  %v509_v48 = vadd.f32 %v900_v46, %v1327_v27  ;;  %v500_v49 = vpop.f32.mrb[5].mxu1 }
 0x1c4   :  { %v576_v50 = vrot.slane %v575_v45, 4  ;;  %v501_v51 = vadd.f32 %v1327_v27, %v500_v49  ;;  %v901_v52 = vpop.f32.mrb[6].mxu1 }
 0x1c5   :  { %v567_v53 = vrot.slane %v566_v47, 4  ;;  %v553_v54 = vmax.f32 %v509_v48, 0.0  ;;  %v512_v55 = vadd.f32 %v901_v52, %v1327_v27  ;;  %v503_v56 = vpop.f32.mrb[7].mxu1 }
 0x1c6   :  { %v577_v57 = vadd.f32 %v576_v50, %v575_v45  ;;  %v551_v58 = vmax.f32 %v501_v51, 0.0  ;;  %v504_v59 = vadd.f32 %v1327_v27, %v503_v56 }
 0x1c7   :  { %v568_v60 = vadd.f32 %v567_v53, %v566_v47  ;;  %v554_v61 = vmax.f32 %v512_v55, 0.0  ;;  %v591_v1 = vsel %vm563_vm6, %v553_v54, 0.0 }
 0x1c8   :  { %v578_v62 = vrot.slane %v577_v57, 2  ;;  %v552_v63 = vmax.f32 %v504_v59, 0.0  ;;  %v582_v4 = vsel %vm563_vm6, %v551_v58, 0.0 }
 0x1c9   :  { %v569_v0 = vrot.slane %v568_v60, 2  ;;  %v592_v2 = vsel %vm563_vm6, %v554_v61, 0.0 }
 0x1ca   :  { %v579_v3 = vadd.f32 %v578_v62, %v577_v57  ;;  %v593_v5 = vadd.f32 %v592_v2, %v591_v1  ;;  %v583_v6 = vsel %vm563_vm6, %v552_v63, 0.0  ;;  %v904_v29 = vpop.f32.mrb[8].mxu1 }
 0x1cb   :  { %v570_v7 = vadd.f32 %v569_v0, %v568_v60  ;;  %v584_v8 = vadd.f32 %v583_v6, %v582_v4  ;;  %v525_v24 = vadd.f32 %v904_v29, %v1327_v27  ;;  %v516_v9 = vpop.f32.mrb[9].mxu1 }
 0x1cc   :  { %v580_v10 = vrot.slane %v579_v3, 1  ;;  %v594_v11 = vrot.slane %v593_v5, 4  ;;  %v517_v41 = vadd.f32 %v1327_v27, %v516_v9  ;;  %v905_v12 = vpop.f32.mrb[10].mxu1 }
 0x1cd   :  { %v571_v13 = vrot.slane %v570_v7, 1  ;;  %v585_v14 = vrot.slane %v584_v8, 4  ;;  %v557_v15 = vmax.f32 %v525_v24, 0.0  ;;  %v528_v16 = vadd.f32 %v905_v12, %v1327_v27  ;;  %v519_v17 = vpop.f32.mrb[11].mxu1 }
 0x1ce   :  { %v581_v18 = vadd.f32 %v580_v10, %v579_v3  ;;  %v595_v19 = vadd.f32 %v594_v11, %v593_v5  ;;  %v555_v20 = vmax.f32 %v517_v41, 0.0  ;;  %v520_v21 = vadd.f32 %v1327_v27, %v519_v17 }
 0x1cf   :  { %v572_v23 = vadd.f32 %v571_v13, %v570_v7  ;;  %v586_v25 = vadd.f32 %v585_v14, %v584_v8  ;;  %v558_v26 = vmax.f32 %v528_v16, 0.0  ;;  %v609_v34 = vsel %vm563_vm6, %v557_v15, 0.0 }
 0x1d0   :  { %v637_v28 = vmul.f32 0.0625, %v581_v18  ;;  %v596_v30 = vrot.slane %v595_v19, 2  ;;  %v556_v31 = vmax.f32 %v520_v21, 0.0  ;;  %v600_v37 = vsel %vm563_vm6, %v555_v20, 0.0 }
 0x1d1   :  { %v636_v32 = vmul.f32 0.0625, %v572_v23  ;;  %v587_v33 = vrot.slane %v586_v25, 2  ;;  %v610_v35 = vsel %vm563_vm6, %v558_v26, 0.0 }
 0x1d2   :  { %v597_v36 = vadd.f32 %v596_v30, %v595_v19  ;;  %v611_v38 = vadd.f32 %v610_v35, %v609_v34  ;;  %v601_v39 = vsel %vm563_vm6, %v556_v31, 0.0  ;;  %v908_v40 = vpop.f32.mrb[12].mxu1 }
 0x1d3   :  { %v668_v42 = vsel %vm667_vm8, %v637_v28, %v636_v32  ;;  %v588_v43 = vadd.f32 %v587_v33, %v586_v25  ;;  %v602_v44 = vadd.f32 %v601_v39, %v600_v37  ;;  %v541_v45 = vadd.f32 %v908_v40, %v1327_v27  ;;  %v532_v22 = vpop.f32.mrb[13].mxu1  ;;  %v824_v37 = vld [vmem:[%s1374_s6] ss:$0 sm:$0xff] }
 0x1d4   :  { %v598_v46 = vrot.slane %v597_v36, 1  ;;  %v612_v47 = vrot.slane %v611_v38, 4  ;;  %v533_v48 = vadd.f32 %v1327_v27, %v532_v22  ;;  %v909_v49 = vpop.f32.mrb[14].mxu1 }
 0x1d5   :  { %v589_v50 = vrot.slane %v588_v43, 1  ;;  %v603_v51 = vrot.slane %v602_v44, 4  ;;  %v561_v52 = vmax.f32 %v541_v45, 0.0  ;;  %v544_v53 = vadd.f32 %v909_v49, %v1327_v27  ;;  %v535_v54 = vpop.f32.mrb[15].mxu1 }
 0x1d6   :  { %v599_v55 = vadd.f32 %v598_v46, %v597_v36  ;;  %v613_v56 = vadd.f32 %v612_v47, %v611_v38  ;;  %v559_v57 = vmax.f32 %v533_v48, 0.0  ;;  %v536_v58 = vadd.f32 %v1327_v27, %v535_v54 }
 0x1d7   :  { %v590_v59 = vadd.f32 %v589_v50, %v588_v43  ;;  %v604_v60 = vadd.f32 %v603_v51, %v602_v44  ;;  %v562_v61 = vmax.f32 %v544_v53, 0.0  ;;  %v627_v63 = vsel %vm563_vm6, %v561_v52, 0.0 }
 0x1d8   :  { %v614_v62 = vrot.slane %v613_v56, 2  ;;  %v560_v0 = vmax.f32 %v536_v58, 0.0  ;;  %v639_v1 = vmul.f32 0.0625, %v599_v55  ;;  %v618_v6 = vsel %vm563_vm6, %v559_v57, 0.0 }
 0x1d9   :  { %v638_v2 = vmul.f32 0.0625, %v590_v59  ;;  %v605_v3 = vrot.slane %v604_v60, 2  ;;  %v628_v4 = vsel %vm563_vm6, %v562_v61, 0.0 }
 0x1da   :  { %v615_v5 = vadd.f32 %v614_v62, %v613_v56  ;;  %v629_v29 = vadd.f32 %v628_v4, %v627_v63  ;;  %v619_v27 = vsel %vm563_vm6, %v560_v0, 0.0 }
 0x1db   :  { %v670_v7 = vsel %vm669_vm4, %v638_v2, %v668_v42  ;;  %v606_v8 = vadd.f32 %v605_v3, %v604_v60  ;;  %v620_v24 = vadd.f32 %v619_v27, %v618_v6 }
 0x1dc   :  { %v616_v9 = vrot.slane %v615_v5, 1  ;;  %v672_v10 = vsel %vm671_vm10, %v639_v1, %v670_v7  ;;  %v630_v11 = vrot.slane %v629_v29, 4 }
 0x1dd   :  { %v607_v41 = vrot.slane %v606_v8, 1  ;;  %v621_v12 = vrot.slane %v620_v24, 4 }
 0x1de   :  { %v617_v13 = vadd.f32 %v616_v9, %v615_v5  ;;  %v631_v14 = vadd.f32 %v630_v11, %v629_v29 }
 0x1df   :  { %v608_v15 = vadd.f32 %v607_v41, %v606_v8  ;;  %v622_v16 = vadd.f32 %v621_v12, %v620_v24 }
 0x1e0   :  { %v632_v17 = vrot.slane %v631_v14, 2  ;;  %v641_v20 = vmul.f32 0.0625, %v617_v13 }
 0x1e1   :  { %v640_v18 = vmul.f32 0.0625, %v608_v15  ;;  %v623_v19 = vrot.slane %v622_v16, 2 }
 0x1e2   :  { %v633_v21 = vadd.f32 %v632_v17, %v631_v14 }
 0x1e3   :  { %v674_v23 = vsel %vm673_vm11, %v640_v18, %v672_v10  ;;  %v624_v25 = vadd.f32 %v623_v19, %v622_v16 }
 0x1e4   :  { %v634_v26 = vrot.slane %v633_v21, 1  ;;  %v676_v28 = vsel %vm675_vm9, %v641_v20, %v674_v23 }
 0x1e5   :  { %v625_v30 = vrot.slane %v624_v25, 1 }
 0x1e6   :  { %v635_v31 = vadd.f32 %v634_v26, %v633_v21 }
 0x1e7   :  { %v626_v32 = vadd.f32 %v625_v30, %v624_v25 }
 0x1e8   :  { %v643_v34 = vmul.f32 0.0625, %v635_v31 }
 0x1e9   :  { %v642_v33 = vmul.f32 0.0625, %v626_v32 }
 0x1eb   :  { %v678_v35 = vsel %vm677_vm12, %v642_v33, %v676_v28 }
 0x1ec   :  { %v680_v36 = vsel %vm679_vm13, %v643_v34, %v678_v35 }
 0x1ed   :  { %927 = vmatmul.mubr.msk.f32.vlgmr.msra.gmra.mrb[16].mxu0 %vm563_vm6, %v680_v36 }
 0x2c0   :  { %v749_v38 = vpop.f32.mrb[16].mxu0 }
 0x2c1   :  { %v750_v39 = vadd.f32 %v824_v37, %v749_v38  ;;  %v928_v40 = vpop.f32.mrb[17].mxu0 }
 0x2c3   :  { %753 = vst [vmem:[%s1375_s7] sm:$0xff] %v750_v39 }

</bundles_post_ra>
